<compile_context>
chip_gen: v7x
topology: tpu7x:2x2x1
jax: 0.10.0
libtpu: 0.0.40
codegen_flags: <defaults>
</compile_context>

<pallas_src>
from itertools import combinations

import jax
import jax.numpy as jnp
import numpy as np
from jax import lax
from jax.experimental import pallas as pl
from jax.experimental.pallas import tpu as pltpu


# ----------------------------------------------------------------------------
# Fused kernel: pair gather -> G_net -> normalize -> nearest centroid -> dist
# ----------------------------------------------------------------------------
def _build_kernel(comb):
    """`comb` is a static Python tuple of (i, j) row-index pairs over W."""

    def kernel(x_ref, w_ref, wab_ref, bias_ref, assign_ref, dist_ref):
        x = x_ref[...]                               # (N, D)
        w = w_ref[...]                               # (K, D)
        d = w_ref.shape[1]

        # G_net weights were stacked [wa ; wb] along the sublane axis by the
        # wrapper (single input DMA); static ref slices are free views.
        wa = wab_ref[0:d, :]                         # (D, D)
        wb = wab_ref[d:2 * d, :]                     # (D, D)

        # Pair gather W[i], W[j]: static sublane slices + concat of the loaded
        # tile (comb is a compile-time constant) -> no selector inputs/matmuls.
        a = jnp.concatenate([w[i:i + 1, :] for i, _ in comb], axis=0)   # (C, D)
        b = jnp.concatenate([w[j:j + 1, :] for _, j in comb], axis=0)   # (C, D)

        # G_net: linear1a(a) + linear1a(b) + linear1b(a*b), as two D-contraction
        # dot_generals summed (no lane-axis concat on the critical path).
        dn = (((1,), (1,)), ((), ()))                # contract last dims, no .T
        merged = (lax.dot_general(a + b, wa, dn, preferred_element_type=jnp.float32)
                  + lax.dot_general(a * b, wb, dn, preferred_element_type=jnp.float32)
                  + bias_ref[...])                   # (C, D)

        # allCentroids = [W ; merged2] (single sublane concat, K+C rows).
        all_c = jnp.concatenate([w, merged], axis=0)                    # (M, D)

        # F.normalize: v / max(||v||_2, 1e-12), via rsqrt (idle EUP slot).
        # Also return the squared norm of the normalized row exactly:
        # 1 for non-zero rows, 0 for all-zero rows (F.normalize zero-row case).
        def _norm(v):
            s = jnp.sum(v * v, axis=1, keepdims=True)
            vn = v * lax.rsqrt(jnp.maximum(s, 1e-24))
            return vn, (s > 0.0).astype(jnp.float32)

        xn, x2 = _norm(x)          # (N, D), (N, 1)
        cn, c2 = _norm(all_c)      # (M, D), (M, 1)

        # Squared distances via ||x||^2 + ||c||^2 - 2 x.c with ONE matmul over
        # the stacked centroid set, ONE min, ONE first-index-on-tie argmin
        # (matches torch.argmin semantics on the combined matrix directly).
        xc = lax.dot_general(xn, cn, dn, preferred_element_type=jnp.float32)  # (N, M)
        d2 = jnp.maximum(x2 + c2.T - 2.0 * xc, 0.0)

        n_rows, m_cols = d2.shape
        min_d2 = jnp.min(d2, axis=1, keepdims=True)                     # (N, 1)
        ids = lax.broadcasted_iota(jnp.int32, (n_rows, m_cols), 1)
        assign_ref[...] = jnp.min(jnp.where(d2 == min_d2, ids, m_cols),
                                  axis=1, keepdims=True)

        # dists = ||normalize(allCentroids[assignment]) - normalize(x)||_F
        #       = sqrt(sum_n min_m dist^2[n, m])   (no one-hot gather matmul).
        dist_ref[...] = jnp.sqrt(jnp.sum(min_d2, keepdims=True))

    return kernel


def _fused_call(x, W, wab, bias2, comb):
    N = x.shape[0]
    # No grid / index maps: single invocation with the whole (tiny) arrays
    # resident in VMEM — avoids length-1-grid scaffolding and per-step overhead.
    assign, dist = pl.pallas_call(
        _build_kernel(comb),
        out_shape=(
            jax.ShapeDtypeStruct((N, 1), jnp.int32),
            jax.ShapeDtypeStruct((1, 1), jnp.float32),
        ),
        in_specs=[pl.BlockSpec(memory_space=pltpu.MemorySpace.VMEM)] * 4,
        out_specs=(pl.BlockSpec(memory_space=pltpu.MemorySpace.VMEM),
                   pl.BlockSpec(memory_space=pltpu.MemorySpace.VMEM)),
    )(x, W, wab, bias2)
    return dist[0, 0], assign[:, 0]


@jax.jit
def dist_loss_forward(x, W, wa, ba, wb, bb):
    K = W.shape[0]
    comb = tuple(combinations(range(K), 2))      # static at trace time
    # Weight prep (constant-folded under jit): stack G_net weights along the
    # sublane axis (one input DMA) and fold the doubled linear1a bias.
    wab = jnp.concatenate([wa, wb], axis=0)      # (2D, D)
    bias2 = (2.0 * ba + bb)[None, :]             # (1, D): linear1a bias appears twice
    return _fused_call(x, W, wab, bias2, comb)


# Pure-JAX reference mirroring the PyTorch forward, for verification.
def ref_forward(x, W, wa, ba, wb, bb, comb_idx):
    a = W[comb_idx[:, 0]]
    b = W[comb_idx[:, 1]]
    merged2 = a @ wa.T + ba + b @ wa.T + ba + (a * b) @ wb.T + bb
    all_c = jnp.concatenate([W, merged2], 0)

    def _norm(v):
        n = jnp.sqrt(jnp.sum(v * v, axis=1, keepdims=True))
        return v / jnp.maximum(n, 1e-12)

    xn, cn = _norm(x), _norm(all_c)
    d = jnp.sqrt(jnp.sum((xn[:, None, :] - cn[None, :, :]) ** 2, axis=-1))
    assignment = jnp.argmin(d, axis=1)
    assigned = all_c[assignment]
    dists = jnp.sqrt(jnp.sum((_norm(assigned) - xn) ** 2))
    return dists, assignment


if __name__ == "__main__":
    K, D, N = 4, 32, 8   # 4 base centroids, G_net hidden dim 32, 8 input rows
    key = jax.random.PRNGKey(0)
    k_w, k_wa, k_ba, k_wb, k_bb, k_x = jax.random.split(key, 6)

    # Deterministic "init" for DistLoss.W and the G_net checkpoint weights.
    W = jax.random.normal(k_w, (K, D), jnp.float32)
    wa = jax.random.normal(k_wa, (D, D), jnp.float32) * 0.2
    ba = jax.random.normal(k_ba, (D,), jnp.float32) * 0.1
    wb = jax.random.normal(k_wb, (D, D), jnp.float32) * 0.2
    bb = jax.random.normal(k_bb, (D,), jnp.float32) * 0.1
    x = jax.random.normal(k_x, (N, D), jnp.float32)

    dists, assignment = dist_loss_forward(x, W, wa, ba, wb, bb)
    dists = jax.block_until_ready(dists)
    assignment = jax.block_until_ready(assignment)

    comb_idx = jnp.asarray(list(combinations(range(K), 2)), dtype=jnp.int32)  # (6, 2)
    ref_d, ref_a = ref_forward(x, W, wa, ba, wb, bb, comb_idx)
    np.testing.assert_array_equal(np.asarray(assignment), np.asarray(ref_a))
    np.testing.assert_allclose(float(dists), float(ref_d), rtol=1e-4, atol=1e-5)

    print("KERNEL_OK")
</pallas_src>

<mosaic_0001>
module attributes {stable_mosaic.version = 11 : i64} {
  func.func @kernel(%arg0: memref<8x32xf32, #tpu.memory_space<vmem>>, %arg1: memref<4x32xf32, #tpu.memory_space<vmem>>, %arg2: memref<64x32xf32, #tpu.memory_space<vmem>>, %arg3: memref<1x32xf32, #tpu.memory_space<vmem>>, %arg4: memref<8x1xi32, #tpu.memory_space<vmem>>, %arg5: memref<1x1xf32, #tpu.memory_space<vmem>>) attributes {dimension_semantics = [], scalar_prefetch = 0 : i64, scratch_operands = 0 : i64, tpu.core_type = #tpu.core_type<tc>} {
    %c0 = arith.constant 0 : index
    %c0_0 = arith.constant 0 : index
    %0 = vector.load %arg0[%c0, %c0_0] : memref<8x32xf32, #tpu.memory_space<vmem>>, vector<8x32xf32>
    %c0_1 = arith.constant 0 : index
    %c0_2 = arith.constant 0 : index
    %1 = vector.load %arg1[%c0_1, %c0_2] : memref<4x32xf32, #tpu.memory_space<vmem>>, vector<4x32xf32>
    %c0_3 = arith.constant 0 : index
    %c0_4 = arith.constant 0 : index
    %2 = vector.load %arg2[%c0_3, %c0_4] : memref<64x32xf32, #tpu.memory_space<vmem>>, vector<32x32xf32>
    %c32 = arith.constant 32 : index
    %c0_5 = arith.constant 0 : index
    %3 = vector.load %arg2[%c32, %c0_5] : memref<64x32xf32, #tpu.memory_space<vmem>>, vector<32x32xf32>
    %4 = vector.extract_strided_slice %1 {offsets = [0, 0], sizes = [1, 32], strides = [1, 1]} : vector<4x32xf32> to vector<1x32xf32>
    %5 = vector.extract_strided_slice %1 {offsets = [0, 0], sizes = [1, 32], strides = [1, 1]} : vector<4x32xf32> to vector<1x32xf32>
    %6 = vector.extract_strided_slice %1 {offsets = [0, 0], sizes = [1, 32], strides = [1, 1]} : vector<4x32xf32> to vector<1x32xf32>
    %7 = vector.extract_strided_slice %1 {offsets = [1, 0], sizes = [1, 32], strides = [1, 1]} : vector<4x32xf32> to vector<1x32xf32>
    %8 = vector.extract_strided_slice %1 {offsets = [1, 0], sizes = [1, 32], strides = [1, 1]} : vector<4x32xf32> to vector<1x32xf32>
    %9 = vector.extract_strided_slice %1 {offsets = [2, 0], sizes = [1, 32], strides = [1, 1]} : vector<4x32xf32> to vector<1x32xf32>
    %10 = tpu.concatenate %4, %5, %6, %7, %8, %9 in 0 : vector<1x32xf32>, vector<1x32xf32>, vector<1x32xf32>, vector<1x32xf32>, vector<1x32xf32>, vector<1x32xf32> -> vector<6x32xf32>
    %11 = vector.extract_strided_slice %1 {offsets = [1, 0], sizes = [1, 32], strides = [1, 1]} : vector<4x32xf32> to vector<1x32xf32>
    %12 = vector.extract_strided_slice %1 {offsets = [2, 0], sizes = [1, 32], strides = [1, 1]} : vector<4x32xf32> to vector<1x32xf32>
    %13 = vector.extract_strided_slice %1 {offsets = [3, 0], sizes = [1, 32], strides = [1, 1]} : vector<4x32xf32> to vector<1x32xf32>
    %14 = vector.extract_strided_slice %1 {offsets = [2, 0], sizes = [1, 32], strides = [1, 1]} : vector<4x32xf32> to vector<1x32xf32>
    %15 = vector.extract_strided_slice %1 {offsets = [3, 0], sizes = [1, 32], strides = [1, 1]} : vector<4x32xf32> to vector<1x32xf32>
    %16 = vector.extract_strided_slice %1 {offsets = [3, 0], sizes = [1, 32], strides = [1, 1]} : vector<4x32xf32> to vector<1x32xf32>
    %17 = tpu.concatenate %11, %12, %13, %14, %15, %16 in 0 : vector<1x32xf32>, vector<1x32xf32>, vector<1x32xf32>, vector<1x32xf32>, vector<1x32xf32>, vector<1x32xf32> -> vector<6x32xf32>
    %18 = arith.addf %10, %17 : vector<6x32xf32>
    %cst = arith.constant dense<0.000000e+00> : vector<6x32xf32>
    %19 = tpu.matmul %18, %2, %cst {dimension_numbers = #tpu.dot_dimension_numbers<[1], [1], [0], [0], [0, 0, 1, 0], [], []>} : vector<6x32xf32>, vector<32x32xf32>, vector<6x32xf32> -> vector<6x32xf32>
    %20 = arith.mulf %10, %17 : vector<6x32xf32>
    %cst_6 = arith.constant dense<0.000000e+00> : vector<6x32xf32>
    %21 = tpu.matmul %20, %3, %cst_6 {dimension_numbers = #tpu.dot_dimension_numbers<[1], [1], [0], [0], [0, 0, 1, 0], [], []>} : vector<6x32xf32>, vector<32x32xf32>, vector<6x32xf32> -> vector<6x32xf32>
    %22 = arith.addf %19, %21 : vector<6x32xf32>
    %c0_7 = arith.constant 0 : index
    %c0_8 = arith.constant 0 : index
    %23 = vector.load %arg3[%c0_7, %c0_8] : memref<1x32xf32, #tpu.memory_space<vmem>>, vector<1x32xf32>
    %24 = vector.broadcast %23 : vector<1x32xf32> to vector<6x32xf32>
    %25 = arith.addf %22, %24 : vector<6x32xf32>
    %26 = tpu.concatenate %1, %25 in 0 : vector<4x32xf32>, vector<6x32xf32> -> vector<10x32xf32>
    %27 = arith.mulf %0, %0 : vector<8x32xf32>
    %cst_9 = arith.constant dense<0.000000e+00> : vector<8xf32>
    %28 = vector.multi_reduction <add>, %27, %cst_9 [1] : vector<8x32xf32> to vector<8xf32>
    %29 = vector.shape_cast %28 : vector<8xf32> to vector<8x1xf32>
    %cst_10 = arith.constant 1.000000e-24 : f32
    %30 = vector.broadcast %cst_10 : f32 to vector<8x1xf32>
    %31 = arith.maximumf %29, %30 : vector<8x1xf32>
    %32 = math.rsqrt %31 : vector<8x1xf32>
    %33 = vector.broadcast %32 : vector<8x1xf32> to vector<8x32xf32>
    %34 = arith.mulf %0, %33 : vector<8x32xf32>
    %cst_11 = arith.constant 0.000000e+00 : f32
    %35 = vector.broadcast %cst_11 : f32 to vector<8x1xf32>
    %36 = arith.cmpf ogt, %29, %35 : vector<8x1xf32>
    %37 = arith.extui %36 : vector<8x1xi1> to vector<8x1xi32>
    %38 = arith.sitofp %37 : vector<8x1xi32> to vector<8x1xf32>
    %39 = arith.mulf %26, %26 : vector<10x32xf32>
    %cst_12 = arith.constant dense<0.000000e+00> : vector<10xf32>
    %40 = vector.multi_reduction <add>, %39, %cst_12 [1] : vector<10x32xf32> to vector<10xf32>
    %41 = vector.shape_cast %40 : vector<10xf32> to vector<10x1xf32>
    %cst_13 = arith.constant 1.000000e-24 : f32
    %42 = vector.broadcast %cst_13 : f32 to vector<10x1xf32>
    %43 = arith.maximumf %41, %42 : vector<10x1xf32>
    %44 = math.rsqrt %43 : vector<10x1xf32>
    %45 = vector.broadcast %44 : vector<10x1xf32> to vector<10x32xf32>
    %46 = arith.mulf %26, %45 : vector<10x32xf32>
    %cst_14 = arith.constant 0.000000e+00 : f32
    %47 = vector.broadcast %cst_14 : f32 to vector<10x1xf32>
    %48 = arith.cmpf ogt, %41, %47 : vector<10x1xf32>
    %49 = arith.extui %48 : vector<10x1xi1> to vector<10x1xi32>
    %50 = arith.sitofp %49 : vector<10x1xi32> to vector<10x1xf32>
    %cst_15 = arith.constant dense<0.000000e+00> : vector<8x10xf32>
    %51 = tpu.matmul %34, %46, %cst_15 {dimension_numbers = #tpu.dot_dimension_numbers<[1], [1], [0], [0], [0, 0, 1, 0], [], []>} : vector<8x32xf32>, vector<10x32xf32>, vector<8x10xf32> -> vector<8x10xf32>
    %52 = tpu.transpose %50, [1, 0] : vector<10x1xf32> -> vector<1x10xf32>
    %53 = vector.broadcast %38 : vector<8x1xf32> to vector<8x10xf32>
    %54 = vector.broadcast %52 : vector<1x10xf32> to vector<8x10xf32>
    %55 = arith.addf %53, %54 : vector<8x10xf32>
    %cst_16 = arith.constant 2.000000e+00 : f32
    %56 = vector.broadcast %cst_16 : f32 to vector<8x10xf32>
    %57 = arith.mulf %56, %51 : vector<8x10xf32>
    %58 = arith.subf %55, %57 : vector<8x10xf32>
    %cst_17 = arith.constant 0.000000e+00 : f32
    %59 = vector.broadcast %cst_17 : f32 to vector<8x10xf32>
    %60 = arith.maximumf %58, %59 : vector<8x10xf32>
    %cst_18 = arith.constant dense<0x7F800000> : vector<8xf32>
    %61 = vector.multi_reduction <minimumf>, %60, %cst_18 [1] : vector<8x10xf32> to vector<8xf32>
    %62 = vector.shape_cast %61 : vector<8xf32> to vector<8x1xf32>
    %63 = tpu.iota {dimensions = array<i32: 1>} : vector<8x10xi32>
    %64 = vector.broadcast %62 : vector<8x1xf32> to vector<8x10xf32>
    %65 = arith.cmpf oeq, %60, %64 : vector<8x10xf32>
    %c10_i32 = arith.constant 10 : i32
    %66 = vector.broadcast %c10_i32 : i32 to vector<8x10xi32>
    %67 = arith.select %65, %63, %66 : vector<8x10xi1>, vector<8x10xi32>
    %cst_19 = arith.constant dense<2147483647> : vector<8xi32>
    %68 = vector.multi_reduction <minsi>, %67, %cst_19 [1] : vector<8x10xi32> to vector<8xi32>
    %69 = vector.shape_cast %68 : vector<8xi32> to vector<8x1xi32>
    %c0_20 = arith.constant 0 : index
    %c0_21 = arith.constant 0 : index
    %70 = vector.load %arg4[%c0_20, %c0_21] : memref<8x1xi32, #tpu.memory_space<vmem>>, vector<8x1xi32>
    tpu.vector_store %arg4[%c0_20, %c0_21], %69 {strides = array<i32>} : memref<8x1xi32, #tpu.memory_space<vmem>>, vector<8x1xi32>,
    %71 = vector.shape_cast %62 : vector<8x1xf32> to vector<1x8x1xf32>
    %cst_22 = arith.constant dense<0.000000e+00> : vector<1xf32>
    %72 = vector.multi_reduction <add>, %71, %cst_22 [1, 2] : vector<1x8x1xf32> to vector<1xf32>
    %73 = vector.shape_cast %72 : vector<1xf32> to vector<1x1x1xf32>
    %74 = vector.extract %73[0, 0, 0] : f32 from vector<1x1x1xf32>
    %75 = vector.broadcast %74 : f32 to vector<1x1xf32>
    %76 = math.sqrt %75 : vector<1x1xf32>
    %c0_23 = arith.constant 0 : index
    %c0_24 = arith.constant 0 : index
    %77 = vector.load %arg5[%c0_23, %c0_24] : memref<1x1xf32, #tpu.memory_space<vmem>>, vector<1x1xf32>
    tpu.vector_store %arg5[%c0_23, %c0_24], %76 {strides = array<i32>} : memref<1x1xf32, #tpu.memory_space<vmem>>, vector<1x1xf32>,
    return
  }
}

</mosaic_0001>

<bundles_post_ra>
// kernel: dist_loss_forward.1
= control target key start
LH: loop header
LB: loop body
LE: loop exit
PB: predicated region body
PF: predicated region fallthrough
CT: control target
= control target key end

     0   :  { %vm55_vm0 = vcmask 261120   ;;  %v568_v3 = vmov 0.0|0.0   ;;  %vm569_vm2 = vmmov 0   ;;  %v570_v8 = vmov 0.0   ;;  %s688_s0 = inlined_call_operand.vmem [shape: f32[8,32], index: 0, kind: input, shape index: {}]   ;;  %s689_s1 = inlined_call_operand.vmem [shape: f32[4,32], index: 1, kind: input, shape index: {}]   ;;  %s690_s2 = inlined_call_operand.vmem [shape: f32[64,32], index: 2, kind: input, shape index: {}]   ;;  %s691_s3 = inlined_call_operand.vmem [shape: f32[1,32], index: 3, kind: input, shape index: {}]   ;;  %s692_s4 = inlined_call_operand.vmem [shape: s32[8,1], index: 4, kind: output, shape index: {0}]   ;;  %s693_s5 = inlined_call_operand.hbm [shape: f32[1,1], index: 5, kind: output, shape index: {1}]  }
   0x1   :  { %v26_v0 = vld [vmem:[%s690_s2 + $0x20] sm:$0xff]  ;;  %v27_v1 = vld [vmem:[%s690_s2 + $0x28] sm:$0xff]  ;;  %510 = vmatprep.subr.bf16.mxu0 %v568_v3  ;;  %518 = vmatprep.subr.bf16.mxu1 %v568_v3  ;;  %vm613_vm1 = vmpackc.low %vm55_vm0, %vm55_vm0  ;;  %vm37_vm3 = vcmask 1040384   ;;  %vm41_vm4 = vcmask 1042432  }
   0x2   :  { %v22_v2 = vld [vmem:[%s690_s2] sm:$0xff]  ;;  %v511_v4 = vpack.c.bf16 %v27_v1, %v26_v0  ;;  %v23_v6 = vld [vmem:[%s690_s2 + $0x8] sm:$0xff]  ;;  %489 = vmatprep.mubr.msk.f32.mxu0 %vm569_vm2, %v570_v8  ;;  %500 = vmatprep.mubr.msk.f32.mxu1 %vm569_vm2, %v570_v8 }
   0x3   :  { %v519_v7 = vpack.c.bf16 %v23_v6, %v22_v2  ;;  %v21_v9 = vld [vmem:[%s689_s1] sm:$0xf] }
   0x4   :  { %513 = vmatpush3.bf16.xpose.msk.msra.mxu0 %vm613_vm1, %v511_v4 }
   0x5   :  { %11 = vsyncpa [#allocation3], 0  ;;  %521 = vmatpush3.bf16.xpose.msk.msra.mxu1 %vm613_vm1, %v519_v7  ;;  %514 = vmatprep.subr.bf16.mxu0 %v568_v3  ;;  %v28_v10 = vld [vmem:[%s690_s2 + $0x30] sm:$0xff]  ;;  %v29_v11 = vld [vmem:[%s690_s2 + $0x38] sm:$0xff]  ;;  %v31_v12 = vrot.slane %v21_v9, 7  ;;  %v33_v13 = vrot.slane %v21_v9, 6  ;;  %v380_v61 = vlaneseq }
   0x6   :  { %vm39_vm5 = vcmask 1041408   ;;  %v47_v14 = vrot.slane %v21_v9, 1  ;;  %522 = vmatprep.subr.bf16.mxu1 %v568_v3  ;;  %v24_v15 = vld [vmem:[%s690_s2 + $0x10] sm:$0xff]  ;;  %v25_v16 = vld [vmem:[%s690_s2 + $0x18] sm:$0xff]  ;;  %v35_v17 = vrot.slane %v21_v9, 5  ;;  %vm43_vm6 = vcmask 1043456  }
   0x7   :  { %v38_v18 = vsel %vm37_vm3, %v21_v9, %v31_v12  ;;  %v515_v20 = vpack.c.bf16 %v29_v11, %v28_v10  ;;  %v523_v22 = vpack.c.bf16 %v25_v16, %v24_v15  ;;  %vm45_vm7 = vcmask 1044480   ;;  %v20_v30 = vld [vmem:[%s688_s0] sm:$0xff] }
   0x8   :  { %v50_v19 = vsel %vm41_vm4, %v47_v14, %v31_v12  ;;  %v40_v21 = vsel %vm39_vm5, %v38_v18, %v33_v13  ;;  %v238_v31 = vmul.f32 %v20_v30, %v20_v30  ;;  %v461_v35 = vld [vmem:[%s691_s3] ss:$0 sm:$0xff]  ;;  %vm253_vm8 = vcmask 254976   ;;  %s571_s3 = smov [#allocation2]  }
   0x9   :  { %v42_v23 = vsel %vm41_vm4, %v40_v21, %v33_v13  ;;  %v51_v24 = vsel %vm43_vm6, %v50_v19, %v31_v12  ;;  %v381_v62 = vshrl.u32 %v380_v61, 7  ;;  %vm388_vm12 = vcmask 80896   ;;  %s441_s13 = sshll.u32 %s571_s3, 4  ;;  %s442_s13 = int_to_ptr.vmem [resolvable:$true] %s441_s13 }
   0xa   :  { %v44_v25 = vsel %vm43_vm6, %v42_v23, %v35_v17  ;;  %v52_v27 = vsel %vm45_vm7, %v51_v24, %v33_v13  ;;  %v239_v32 = vsel %vm55_vm0, %v238_v31, 0.0  ;;  %v393_v11 = vand.u32 127, %v380_v61  ;;  %s544_s14 = scalar_lea.vmem %s442_s13, 16  ;;  %s548_s15 = scalar_lea.vmem %s442_s13, 32 }
   0xb   :  { %v46_v26 = vsel %vm45_vm7, %v44_v25, %v35_v17  ;;  %240 = vadd.xlane.f32.xlu1 %v239_v32  ;;  %v382_v63 = vsub.s32 0, %v381_v62  ;;  %vm411_vm13 = vcmask 7168   ;;  %p545_p0 = scmp.ne.s32.totalorder %s442_s13, %s544_s14  ;;  %p549_p1 = scmp.lt.s32.totalorder %s442_s13, %s442_s13 }
   0xc   :  { %517 = vmatpush3.bf16.xpose.msk.msra.mxu0 %vm613_vm1, %v515_v20  ;;  %v54_v28 = vmul.f32 %v52_v27, %v46_v26  ;;  %v53_v29 = vadd.f32 %v52_v27, %v46_v26  ;;  %p550_p2 = scmp.lt.s32.totalorder %s548_s15, %s544_s14 }
   0xd   :  { %525 = vmatpush3.bf16.xpose.msk.msra.mxu1 %vm613_vm1, %v523_v22  ;;  %526 = vmatprep.subr.bf16.mxu0 %v568_v3 }
   0xe   :  { %p551_p3 = por %p550_p2, %p549_p1 }
  0x10   :  { %p552_p4 = pnand %p551_p3, %p545_p0 }
  0x13   :  { %490 = vmatmul.mubr.msk.f32.vlgmr.msra.gmra.mrb[0].mxu0 %vm55_vm0, %v54_v28 }
  0x14   :  { %501 = vmatmul.mubr.msk.f32.vlgmr.msra.gmra.mrb[0].mxu1 %vm55_vm0, %v53_v29  ;;  %507 = vmatprep.mubr.msk.f32.mxu0 %vm569_vm2, %v570_v8 }
  0x98   :  { %v241_v51 = vpop.xlane.xlu1 %240 }
  0x99   :  { %v242_v53 = vmax.f32 %v241_v51, 1e-24  ;;  %vm245_vm11 = vcmp.gt.f32.partialorder %v241_v51, 0.0 }
  0x9a   :  { %v462_v2 = vsel %vm245_vm11, 1.0, %v570_v8 }
  0xe6   :  { %v137_v33 = vpop.f32.mrb[0].mxu0 }
  0xe7   :  { %v222_v34 = vpop.f32.mrb[0].mxu1  ;;  %v491_v36 = vpop.f32.mrb[1].mxu0 }
  0xe8   :  { %v223_v37 = vadd.f32 %v222_v34, %v137_v33  ;;  %v502_v38 = vpop.f32.mrb[1].mxu1 }
  0xea   :  { %v233_v39 = vadd.f32 %v461_v35, %v223_v37 }
  0xec   :  { %v235_v40 = vrot.slane %v233_v39, 4 }
  0xee   :  { %v237_v41 = vsel %vm43_vm6, %v21_v9, %v235_v40  ;;  %v249_v44 = vmul.f32 %v235_v40, %v235_v40 }
  0xef   :  { %v248_v42 = vmul.f32 %v237_v41, %v237_v41 }
  0xf0   :  { %v254_v45 = vsel %vm253_vm8, %v249_v44, 0.0 }
  0xf1   :  { %v250_v43 = vsel %vm55_vm0, %v248_v42, 0.0 }
  0xf2   :  { %251 = vadd.xlane.f32.xlu0 %v250_v43 }
  0xf6   :  { %255 = vadd.xlane.f32.xlu0 %v254_v45 }
 0x17f   :  { %v252_v46 = vpop.xlane.xlu0 %251 }
 0x180   :  { %v257_v47 = vmax.f32 %v252_v46, 1e-24  ;;  %vm263_vm9 = vcmp.gt.f32.partialorder %v252_v46, 0.0 }
 0x181   :  { %v463_v48 = vsel %vm263_vm9, 1.0, %v570_v8 }
 0x182   :  { %348 = vxpose.xlu1.b32.start [1/2] (short) (narrow) %v463_v48, 8  ;;  %536 = vrsqrt.f32 %v257_v47 }
 0x183   :  { %v256_v49 = vpop.xlane.xlu0 %255 }
 0x184   :  { %v258_v50 = vmax.f32 %v256_v49, 1e-24  ;;  %vm264_vm10 = vcmp.gt.f32.partialorder %v256_v49, 0.0 }
 0x185   :  { %v464_v52 = vsel %vm264_vm10, 1.0, %v570_v8 }
 0x186   :  { %538 = vrsqrt.f32 %v258_v50  ;;  %349 = vxpose.xlu1.b32.end [2/2] (short) (narrow) %v464_v52, 8 }
 0x187   :  { %540 = vrsqrt.f32 %v242_v53 }
 0x18c   :  { %v537_v54 = vpop.eup %536 }
 0x18d   :  { %v261_v56 = vmul.f32 %v537_v54, %v237_v41 }
 0x190   :  { %v539_v55 = vpop.eup %538 }
 0x191   :  { %v262_v57 = vmul.f32 %v539_v55, %v235_v40  ;;  %v541_v59 = vpop.eup %540 }
 0x192   :  { %v244_v60 = vmul.f32 %v541_v59, %v20_v30 }
 0x193   :  { %v527_v58 = vpack.c.bf16 %v262_v57, %v261_v56 }
 0x195   :  { %529 = vmatpush3.bf16.xpose.msk.msra.mxu0 %vm613_vm1, %v527_v58  ;;  %vm431_vm1 = vcmask 0  }
 0x19c   :  { %508 = vmatmul.mubr.msk.f32.vlgmr.msra.gmra.mrb[2].mxu0 %vm55_vm0, %v244_v60 }
 0x202   :  { %v364_v0 = vpop.trf.xlu1 }
 0x203   :  { %v383_v1 = vrot.slane %v364_v0, %v382_v63 }
 0x205   :  { %v384_v4 = vadd.f32 %v462_v2, %v383_v1 }
 0x26f   :  { %v344_v3 = vpop.f32.mrb[2].mxu0 }
 0x270   :  { %v385_v6 = vmul.f32 2.0, %v344_v3  ;;  %v509_v7 = vpop.f32.mrb[3].mxu0 }
 0x272   :  { %v386_v9 = vsub.f32 %v384_v4, %v385_v6 }
 0x274   :  { %v387_v10 = vmax.f32 %v386_v9, 0.0 }
 0x276   :  { %v389_v5 = vsel %vm388_vm12, %v387_v10, inf }
 0x277   :  { %390 = vmin.xlane.f32.xlu0 %v389_v5 }
 0x304   :  { %v391_v12 = vpop.xlane.xlu0 %390 }
 0x305   :  { %vm394_vm14 = vcmp.eq.f32.partialorder %v387_v10, %v391_v12  ;;  %v413_v13 = vsel %vm411_vm13, %v391_v12, 0.0 }
 0x306   :  { %v395_v14 = vsel %vm394_vm14, %v393_v11, 10  ;;  %414 = vadd.xlane.f32.xlu0 %v413_v13 }
 0x307   :  { %v396_v15 = vsel %vm388_vm12, %v395_v14, 2147483647 }
 0x308   :  { %v398_v16 = vshra.s32 %v396_v15, 16  ;;  %v397_v19 = vand.u32 65535, %v396_v15 }
 0x30a   :  { %v400_v8 = vcvt.s32.f32 %v398_v16  ;;  %v399_v23 = vcvt.s32.f32 %v397_v19 }
 0x30c   :  { %401 = vmin.xlane.f32.xlu0 %v400_v8 }
 0x393   :  { %v415_v17 = vpop.xlane.xlu0 %414 }
 0x394   :  { %v416_v18 = vrot.slane %v415_v17, 4 }
 0x396   :  { %v417_v20 = vadd.f32 %v416_v18, %v415_v17 }
 0x398   :  { %v418_v21 = vrot.slane %v417_v20, 2 }
 0x399   :  { %v402_v22 = vpop.xlane.xlu0 %401 }
 0x39a   :  { %vm403_vm15 = vcmp.eq.f32.partialorder %v400_v8, %v402_v22  ;;  %v419_v24 = vadd.f32 %v418_v21, %v417_v20 }
 0x39b   :  { %v404_v25 = vsel %vm403_vm15, %v399_v23, inf }
 0x39c   :  { %405 = vmin.xlane.f32.xlu0 %v404_v25  ;;  %v420_v26 = vrot.slane %v419_v24, 1 }
 0x39e   :  { %v421_v27 = vadd.f32 %v420_v26, %v419_v24 }
 0x3a0   :  { %530 = vpush %v421_v27 }
 0x3d1   :  { %s531_s0 = spop %530 }
 0x3d2   :  { %v423_v28 = vstv %s531_s0 }
 0x3d3   :  { %542 = vrsqrt.f32 %v423_v28  ;;  %vm426_vm0 = vcmp.eq.f32.partialorder %v423_v28, inf  ;;  %v429_v31 = vand.u32 2147483648, %v423_v28  ;;  %vm428_vm2 = vcmp.eq.f32.partialorder %v423_v28, 0.0 }
 0x3dd   :  { %v543_v29 = vpop.eup %542 }
 0x3de   :  { %v425_v30 = vmul.f32 %v543_v29, %v423_v28 }
 0x3e0   :  { %v427_v32 = vsel %vm426_vm0, %v423_v28, %v425_v30 }
 0x3e1   :  { %v430_v33 = vsel %vm428_vm2, %v429_v31, %v427_v32 }
 0x3e2   :  { %432 = vst.msk [vmem:[#allocation2] sm:$0x1] %vm431_vm1, %v430_v33 }
 0x3e3   :  { %555 = shalt.err (!%p552_p4)
}
 0x3e4   :  { %s556_s18 = scalar_lea.hbm %s693_s5, 16 }
 0x3e5   :  { %p557_p5 = scmp.ne.s32.totalorder %s693_s5, %s556_s18  ;;  %p560_p6 = scmp.lt.u32.totalorder %s556_s18, %s693_s5 }
 0x3e7   :  { %p562_p7 = pnand %p560_p6, %p557_p5 }
 0x3e9   :  { %565 = shalt.err (!%p562_p7)
}
 0x3ea   :  { %444 = dma.vmem_to_hbm [thread:$0]  %s442_s13, 16, %s693_s5, [#allocation3]   ;;  %v408_v34 = vcvt.f32.s32 %v402_v22 }
 0x3ec   :  { %v409_v36 = vshll.u32 %v408_v34, 16 }
 0x429   :  { %v406_v35 = vpop.xlane.xlu0 %405 }
 0x42a   :  { %v407_v37 = vcvt.f32.s32 %v406_v35 }
 0x42c   :  { %v410_v38 = vadd.s32 %v409_v36, %v407_v37 }
 0x42e   :  { %412 = vst.msk [vmem:[%s692_s4] sm:$0xff] %vm411_vm13, %v410_v38 }
 0x42f   :  { %566 = dma.done.wait [#allocation3], 16  }
 0x430   :  { %567 = vsyncadd [#allocation3], 4294967280 }
 0x431   :  { %450 = vsyncpa [#allocation3], 1 }

</bundles_post_ra>
